<compile_context>
chip_gen: v5e
topology: v5e:2x2
jax: 0.10.0
libtpu: 0.0.40
codegen_flags: <defaults>
</compile_context>

<pallas_src>
import jax
import jax.numpy as jnp
from jax.experimental import pallas as pl
from jax.experimental.pallas import tpu as pltpu

BN_EPS = 1e-5
LANE = 128


def _round_up(v, m):
    return ((v + m - 1) // m) * m


def _derive_vmem_limit(B, D, tile_n, w_itemsize):
    """Size the scoped-VMEM limit from the real buffers instead of hardcoding."""
    x_bytes = B * D * 4                 # resident f32 batch (constant index map)
    w_panel = D * tile_n * w_itemsize   # weight column panel (double-buffered)
    o_panel = B * tile_n * 4            # output panel (double-buffered)
    b_panel = tile_n * 4                # bias panel
    need = 2 * x_bytes + 2 * w_panel + 2 * o_panel + 2 * b_panel + 4 * D * 4
    need = int(need * 1.5) + (2 << 20)  # headroom for compiler temporaries
    try:
        phys = pltpu.get_tpu_info().vmem_capacity_bytes
    except Exception:
        phys = 64 * 1024 * 1024         # conservative: v7x per-TC VMEM
    cap = int(phys * 3 // 4)            # leave headroom vs. physical
    return max(16 * 1024 * 1024, min(need, cap))


def _dynamic_linear_kernel(x_ref, gamma_ref, beta_ref, w_ref, b_ref, o_ref):
    """One output-column tile of: out = bias + relu(batchnorm(x)) @ w.

    x_ref:     (B, D)       f32           full batch (BN stats need all rows)
    gamma_ref: (1, D)       f32           BatchNorm weight
    beta_ref:  (1, D)       f32           BatchNorm bias
    w_ref:     (D, TILE_N)  matmul dtype  weight column panel (no in-kernel cast)
    b_ref:     (1, TILE_N)  f32           bias panel
    o_ref:     (B, TILE_N)  f32           output panel

    BN+ReLU is recomputed per tile (cheap vs. the matmul) so there is no
    cross-iteration state and the grid axis can be "parallel".
    """
    x = x_ref[...].astype(jnp.float32)
    mean = jnp.mean(x, axis=0, keepdims=True)                    # (1, D), XLU
    centered = x - mean
    var = jnp.mean(centered * centered, axis=0, keepdims=True)   # biased var
    # Fold the BN affine: x_bn = x * scale + shift  (rsqrt -> EUP slot).
    scale = gamma_ref[...] * jax.lax.rsqrt(var + BN_EPS)
    shift = beta_ref[...] - mean * scale
    x_act = jnp.maximum(x * scale + shift, 0.0).astype(w_ref.dtype)

    # MXU matmul: operands already in matmul dtype, f32 accumulation.
    acc = jnp.dot(x_act, w_ref[...], preferred_element_type=jnp.float32)
    o_ref[...] = (acc + b_ref[...]).astype(o_ref.dtype)


def dynamic_linear_forward(x, gamma, beta, weights1, bias1, current_out_dim,
                           *, matmul_dtype=jnp.bfloat16, tile_n=256,
                           vmem_limit_bytes=None, slice_output=True):
    """Fused BatchNorm1d(train) + ReLU + addmm, tiled lane-dense over N.

    `weights1` is ideally stored in `matmul_dtype` by the caller; if it is not,
    it is cast once here (outside the per-tile path).  Set slice_output=False
    to get the (B, n_pad) lane-padded result and avoid the extra slice copy.
    """
    x = x.astype(jnp.float32)
    B, D = x.shape
    in_dim_w, max_out_dim = weights1.shape
    if current_out_dim > max_out_dim:
        raise ValueError("DynamicLinear: current_out_dim exceeds max_out_dim")
    if D != in_dim_w:
        print(f"! WARNING !: branch_emb_size turns out to be {D} "
              f"rather than {in_dim_w}")
        # Rare path: slice here so the kernel's (D, tile_n) weight block stays
        # (8,128)-clean regardless of D vs. in_dim_w.
        weights1 = weights1[:D, :]

    # Weight dtype policy: pass the MXU operand dtype straight into the kernel.
    w_in = weights1 if weights1.dtype == matmul_dtype else weights1.astype(matmul_dtype)

    # Lane-dense output panels.  tile_n defaults to 256 (fills the v6e/v7x
    # 256-wide MXU); clamp to the lane-rounded current_out_dim so small layers
    # don't pad up to a needlessly wide panel.
    tile_n = _round_up(max(int(tile_n), LANE), LANE)
    tile_n_eff = max(LANE, min(tile_n, _round_up(current_out_dim, LANE)))
    n_pad = _round_up(current_out_dim, tile_n_eff)
    grid_n = n_pad // tile_n_eff

    # Only pad (once, cheap) when the whole layer is narrower than the padded
    # width; otherwise the grid simply restricts which column panels we visit.
    if w_in.shape[1] < n_pad:
        w_in = jnp.pad(w_in, ((0, 0), (0, n_pad - w_in.shape[1])))
        b_in = jnp.pad(bias1, (0, n_pad - bias1.shape[0]))
    else:
        b_in = bias1
    b_in = b_in.reshape(1, -1).astype(jnp.float32)
    gamma2 = gamma.reshape(1, D).astype(jnp.float32)
    beta2 = beta.reshape(1, D).astype(jnp.float32)

    if vmem_limit_bytes is None:
        vmem_limit_bytes = _derive_vmem_limit(B, D, tile_n_eff,
                                              jnp.dtype(matmul_dtype).itemsize)

    out_padded = pl.pallas_call(
        _dynamic_linear_kernel,
        out_shape=jax.ShapeDtypeStruct((B, n_pad), jnp.float32),
        grid_spec=pltpu.PrefetchScalarGridSpec(
            num_scalar_prefetch=0,
            grid=(grid_n,),
            in_specs=[
                pl.BlockSpec((B, D), lambda j: (0, 0)),            # x (resident)
                pl.BlockSpec((1, D), lambda j: (0, 0)),            # gamma
                pl.BlockSpec((1, D), lambda j: (0, 0)),            # beta
                pl.BlockSpec((D, tile_n_eff), lambda j: (0, j)),   # weight panel
                pl.BlockSpec((1, tile_n_eff), lambda j: (0, j)),   # bias panel
            ],
            out_specs=pl.BlockSpec((B, tile_n_eff), lambda j: (0, j)),
        ),
        compiler_params=pltpu.CompilerParams(
            # No cross-iteration state (BN recomputed per tile), so the N axis
            # can be sharded across TensorCores on v7x; neutral on v5e/v6e.
            dimension_semantics=("parallel",),
            vmem_limit_bytes=int(vmem_limit_bytes),
        ),
    )(x, gamma2, beta2, w_in, b_in)

    if slice_output and n_pad != current_out_dim:
        return out_padded[:, :current_out_dim]
    return out_padded


def _reference_f32(x, gamma, beta, weights1, bias1, current_out_dim):
    mean = jnp.mean(x, axis=0, keepdims=True)
    var = jnp.mean((x - mean) ** 2, axis=0, keepdims=True)
    xn = (x - mean) * jax.lax.rsqrt(var + BN_EPS) * gamma + beta
    xr = jnp.maximum(xn, 0.0)
    w = weights1[:x.shape[1], :current_out_dim]
    b = bias1[:current_out_dim]
    return xr @ w + b


def _reference_matched(x, gamma, beta, weights1, bias1, current_out_dim, matmul_dtype):
    """Reference with the same operand-precision policy as the kernel."""
    mean = jnp.mean(x, axis=0, keepdims=True)
    var = jnp.mean((x - mean) ** 2, axis=0, keepdims=True)
    xn = (x - mean) * jax.lax.rsqrt(var + BN_EPS) * gamma + beta
    xr = jnp.maximum(xn, 0.0).astype(matmul_dtype)
    w = weights1[:x.shape[1], :current_out_dim].astype(matmul_dtype)
    b = bias1[:current_out_dim]
    return jnp.dot(xr, w, preferred_element_type=jnp.float32) + b


if __name__ == "__main__":
    # Small shapes consistent with the module:
    # DynamicLinear(input_dim=32, max_out_dim=64, initial_out_dim=48), batch=8.
    input_dim = 32
    max_out_dim = 64
    current_out_dim = 48
    batch = 8

    key = jax.random.PRNGKey(0)
    kx, kw = jax.random.split(key)

    x = jax.random.normal(kx, (batch, input_dim), dtype=jnp.float32)

    # Parameter init matching __init__:
    #   w1 = (2 * rand - 1) / sqrt(input_dim);  bias1 = zeros
    #   BatchNorm1d affine: gamma = ones, beta = zeros
    w1 = jax.random.uniform(kw, (input_dim, max_out_dim), dtype=jnp.float32)
    w1 = (2.0 * w1 - 1.0) / (input_dim ** 0.5)
    bias1 = jnp.zeros((max_out_dim,), dtype=jnp.float32)
    gamma = jnp.ones((input_dim,), dtype=jnp.float32)
    beta = jnp.zeros((input_dim,), dtype=jnp.float32)

    # Default path: bf16 MXU operands (weights cast once in the wrapper;
    # production callers would store bf16 weights), f32 accumulation.
    out = dynamic_linear_forward(x, gamma, beta, w1, bias1, current_out_dim)
    out = jax.block_until_ready(out)
    assert out.shape == (batch, current_out_dim)
    assert out.dtype == jnp.float32

    ref_matched = _reference_matched(x, gamma, beta, w1, bias1,
                                     current_out_dim, jnp.bfloat16)
    ref_f32 = _reference_f32(x, gamma, beta, w1, bias1, current_out_dim)
    assert jnp.allclose(out, ref_matched, atol=5e-3, rtol=5e-3), \
        float(jnp.max(jnp.abs(out - ref_matched)))
    assert jnp.allclose(out, ref_f32, atol=3e-2, rtol=3e-2), \
        float(jnp.max(jnp.abs(out - ref_f32)))

    # Full-precision operand path matches the f32 reference closely.
    out_f32 = dynamic_linear_forward(x, gamma, beta, w1, bias1, current_out_dim,
                                     matmul_dtype=jnp.float32)
    out_f32 = jax.block_until_ready(out_f32)
    assert jnp.allclose(out_f32, ref_f32, atol=1e-3, rtol=1e-3), \
        float(jnp.max(jnp.abs(out_f32 - ref_f32)))

    print("KERNEL_OK")
</pallas_src>

<mosaic_0001>
module attributes {stable_mosaic.version = 11 : i64} {
  func.func @_dynamic_linear_kernel(%arg0: i32, %arg1: memref<8x32xf32, #tpu.memory_space<vmem>>, %arg2: memref<1x32xf32, #tpu.memory_space<vmem>>, %arg3: memref<1x32xf32, #tpu.memory_space<vmem>>, %arg4: memref<32x128xbf16, #tpu.memory_space<vmem>>, %arg5: memref<1x128xf32, #tpu.memory_space<vmem>>, %arg6: memref<8x128xf32, #tpu.memory_space<vmem>>) attributes {dimension_semantics = [#tpu.dimension_semantics<parallel>], iteration_bounds = array<i64: 1>, scalar_prefetch = 0 : i64, scratch_operands = 0 : i64, tpu.core_type = #tpu.core_type<tc>, window_params = [{pipeline_mode = #tpu.pipeline_mode<synchronous>, transform_indices = @transform_0, window_bounds = array<i64: 8, 32>}, {pipeline_mode = #tpu.pipeline_mode<synchronous>, transform_indices = @transform_1, window_bounds = array<i64: 1, 32>}, {pipeline_mode = #tpu.pipeline_mode<synchronous>, transform_indices = @transform_2, window_bounds = array<i64: 1, 32>}, {transform_indices = @transform_3, window_bounds = array<i64: 32, 128>}, {transform_indices = @transform_4, window_bounds = array<i64: 1, 128>}, {transform_indices = @transform_5, window_bounds = array<i64: 8, 128>}]} {
    %c0 = arith.constant 0 : index
    %c0_0 = arith.constant 0 : index
    %0 = vector.load %arg1[%c0, %c0_0] : memref<8x32xf32, #tpu.memory_space<vmem>>, vector<8x32xf32>
    %cst = arith.constant dense<0.000000e+00> : vector<32xf32>
    %1 = vector.multi_reduction <add>, %0, %cst [0] : vector<8x32xf32> to vector<32xf32>
    %2 = vector.shape_cast %1 : vector<32xf32> to vector<1x32xf32>
    %cst_1 = arith.constant 8.000000e+00 : f32
    %3 = vector.broadcast %cst_1 : f32 to vector<1x32xf32>
    %4 = arith.divf %2, %3 : vector<1x32xf32>
    %5 = vector.broadcast %4 : vector<1x32xf32> to vector<8x32xf32>
    %6 = arith.subf %0, %5 : vector<8x32xf32>
    %7 = arith.mulf %6, %6 : vector<8x32xf32>
    %cst_2 = arith.constant dense<0.000000e+00> : vector<32xf32>
    %8 = vector.multi_reduction <add>, %7, %cst_2 [0] : vector<8x32xf32> to vector<32xf32>
    %9 = vector.shape_cast %8 : vector<32xf32> to vector<1x32xf32>
    %cst_3 = arith.constant 8.000000e+00 : f32
    %10 = vector.broadcast %cst_3 : f32 to vector<1x32xf32>
    %11 = arith.divf %9, %10 : vector<1x32xf32>
    %c0_4 = arith.constant 0 : index
    %c0_5 = arith.constant 0 : index
    %12 = vector.load %arg2[%c0_4, %c0_5] : memref<1x32xf32, #tpu.memory_space<vmem>>, vector<1x32xf32>
    %cst_6 = arith.constant 9.99999974E-6 : f32
    %13 = vector.broadcast %cst_6 : f32 to vector<1x32xf32>
    %14 = arith.addf %11, %13 : vector<1x32xf32>
    %15 = math.rsqrt %14 : vector<1x32xf32>
    %16 = arith.mulf %12, %15 : vector<1x32xf32>
    %c0_7 = arith.constant 0 : index
    %c0_8 = arith.constant 0 : index
    %17 = vector.load %arg3[%c0_7, %c0_8] : memref<1x32xf32, #tpu.memory_space<vmem>>, vector<1x32xf32>
    %18 = arith.mulf %4, %16 : vector<1x32xf32>
    %19 = arith.subf %17, %18 : vector<1x32xf32>
    %20 = vector.broadcast %16 : vector<1x32xf32> to vector<8x32xf32>
    %21 = arith.mulf %0, %20 : vector<8x32xf32>
    %22 = vector.broadcast %19 : vector<1x32xf32> to vector<8x32xf32>
    %23 = arith.addf %21, %22 : vector<8x32xf32>
    %cst_9 = arith.constant 0.000000e+00 : f32
    %24 = vector.broadcast %cst_9 : f32 to vector<8x32xf32>
    %25 = arith.maximumf %23, %24 : vector<8x32xf32>
    %26 = arith.truncf %25 : vector<8x32xf32> to vector<8x32xbf16>
    %c0_10 = arith.constant 0 : index
    %c0_11 = arith.constant 0 : index
    %27 = vector.load %arg4[%c0_10, %c0_11] : memref<32x128xbf16, #tpu.memory_space<vmem>>, vector<32x128xbf16>
    %cst_12 = arith.constant dense<0.000000e+00> : vector<8x128xf32>
    %28 = tpu.matmul %26, %27, %cst_12 {dimension_numbers = #tpu.dot_dimension_numbers<[1], [0], [0], [1], [0, 0, 1, 1], [], []>} : vector<8x32xbf16>, vector<32x128xbf16>, vector<8x128xf32> -> vector<8x128xf32>
    %c0_13 = arith.constant 0 : index
    %c0_14 = arith.constant 0 : index
    %29 = vector.load %arg5[%c0_13, %c0_14] : memref<1x128xf32, #tpu.memory_space<vmem>>, vector<1x128xf32>
    %30 = vector.broadcast %29 : vector<1x128xf32> to vector<8x128xf32>
    %31 = arith.addf %28, %30 : vector<8x128xf32>
    %c0_15 = arith.constant 0 : index
    %c0_16 = arith.constant 0 : index
    %32 = vector.load %arg6[%c0_15, %c0_16] : memref<8x128xf32, #tpu.memory_space<vmem>>, vector<8x128xf32>
    tpu.vector_store %arg6[%c0_15, %c0_16], %31 {strides = array<i32>} : memref<8x128xf32, #tpu.memory_space<vmem>>, vector<8x128xf32>,
    return
  }
  func.func @transform_0(%arg0: i32) -> (i32, i32) {
    %c0_i32 = arith.constant 0 : i32
    %c0_i32_0 = arith.constant 0 : i32
    %c0_i32_1 = arith.constant 0 : i32
    return %c0_i32, %c0_i32_0 : i32, i32
  }
  func.func @transform_1(%arg0: i32) -> (i32, i32) {
    %c0_i32 = arith.constant 0 : i32
    %c0_i32_0 = arith.constant 0 : i32
    %c0_i32_1 = arith.constant 0 : i32
    return %c0_i32, %c0_i32_0 : i32, i32
  }
  func.func @transform_2(%arg0: i32) -> (i32, i32) {
    %c0_i32 = arith.constant 0 : i32
    %c0_i32_0 = arith.constant 0 : i32
    %c0_i32_1 = arith.constant 0 : i32
    return %c0_i32, %c0_i32_0 : i32, i32
  }
  func.func @transform_3(%arg0: i32) -> (i32, i32) {
    %c0_i32 = arith.constant 0 : i32
    %c0_i32_0 = arith.constant 0 : i32
    return %c0_i32, %arg0 : i32, i32
  }
  func.func @transform_4(%arg0: i32) -> (i32, i32) {
    %c0_i32 = arith.constant 0 : i32
    %c0_i32_0 = arith.constant 0 : i32
    return %c0_i32, %arg0 : i32, i32
  }
  func.func @transform_5(%arg0: i32) -> (i32, i32) {
    %c0_i32 = arith.constant 0 : i32
    %c0_i32_0 = arith.constant 0 : i32
    return %c0_i32, %arg0 : i32, i32
  }
}

</mosaic_0001>

<bundles_post_ra>
// kernel: tpu_custom_call.1
= control target key start
LH: loop header
LB: loop body
LE: loop exit
PB: predicated region body
PF: predicated region fallthrough
CT: control target
= control target key end

     0   :  { %10 = vsyncpa [#allocation3], 0  ;;  %s356_s0 = inlined_call_operand.hbm [shape: f32[8,32], index: 0, kind: input, shape index: {}]   ;;  %s357_s1 = inlined_call_operand.hbm [shape: f32[1,32], index: 1, kind: input, shape index: {}]   ;;  %s358_s2 = inlined_call_operand.vmem [shape: f32[1,32], index: 2, kind: input, shape index: {}]   ;;  %s359_s3 = inlined_call_operand.hbm [shape: bf16[32,128], index: 3, kind: input, shape index: {}]   ;;  %s360_s4 = inlined_call_operand.vmem [shape: f32[1,128], index: 4, kind: input, shape index: {}]   ;;  %s361_s5 = inlined_call_operand.hbm [shape: f32[8,128], index: 5, kind: output, shape index: {}]  }
   0x1   :  { %11 = vsyncpa [#allocation6], 0  ;;  %s29_s20 = sshll.u32 %s357_s1, 4  ;;  %s30_s20 = int_to_ptr.hbm [resolvable:$true] %s29_s20 }
   0x2   :  { %12 = vsyncpa [#allocation4], 0  ;;  %s298_s21 = smov [#allocation5]   ;;  %s18_s25 = sshll.u32 %s356_s0, 4  ;;  %s19_s25 = int_to_ptr.hbm [resolvable:$true] %s18_s25 }
   0x3   :  { %s31_s22 = sshll.u32 %s298_s21, 4  ;;  %s299_s26 = smov [#allocation2]   ;;  %s32_s22 = int_to_ptr.vmem [resolvable:$true] %s31_s22 }
   0x4   :  { %34 = dma.hbm_to_vmem [thread:$0]  %s30_s20, 16, %s32_s22, [#allocation6]  }
   0x5   :  { %s20_s27 = sshll.u32 %s299_s26, 4  ;;  %s41_s30 = sshll.u32 %s359_s3, 4  ;;  %s21_s27 = int_to_ptr.vmem [resolvable:$true] %s20_s27  ;;  %s42_s30 = int_to_ptr.hbm [resolvable:$true] %s41_s30 }
   0x6   :  { %23 = dma.hbm_to_vmem [thread:$0]  %s19_s25, 128, %s21_s27, [#allocation3]  }
   0x7   :  { %s300_s1 = smov [#allocation7]   ;;  %s301_s7 = smov 64  }
   0x8   :  { %s43_s6 = sshll.u32 %s300_s1, 4  ;;  %s302_s8 = smov 4   ;;  %s44_s6 = int_to_ptr.vmem [resolvable:$true] %s43_s6 }
   0x9   :  { %49 = dma.hbm_to_vmem [thread:$0]  %s42_s30, 256, %s44_s6, [#allocation6], %s301_s7, %s301_s7, %s302_s8  }
   0xa   :  { %292 = dma.done.wait [#allocation3], 128  }
   0xb   :  { %293 = vsyncadd [#allocation3], 4294967168 }
   0xc   :  { %294 = dma.done.wait [#allocation6], 272  }
   0xd   :  { %295 = vsyncadd [#allocation6], 4294967024  ;;  %v303_v0 = vmov 8.0   ;;  %vm66_vm0 = vcmask 261120   ;;  %v183_v2 = vld [vmem:[#allocation7 + $0x8] sm:$0xff]  ;;  %v65_v3 = vld [vmem:[#allocation2] sm:$0xff] }
   0xe   :  { %192 = vrcp.f32 %v303_v0  ;;  %v67_v4 = vsel %vm66_vm0, %v65_v3, 0.0  ;;  %147 = vmatpush.bf16.msra.mxu0 %v183_v2  ;;  %v182_v6 = vld [vmem:[#allocation7] sm:$0xff]  ;;  %v92_v34 = vld [vmem:[#allocation5] sm:$0x1]  ;;  %v105_v38 = vld [vmem:[%s358_s2] sm:$0x1] }
   0xf   :  { %v68_v7 = vrot.slane %v67_v4, 4  ;;  %v191_v47 = vld [vmem:[%s360_s4] ss:$0 sm:$0xff]  ;;  %s304_s11 = smov [#allocation8]   ;;  %s162_s2 = sshll.u32 %s361_s5, 4  ;;  %s163_s2 = int_to_ptr.hbm [resolvable:$true] %s162_s2 }
  0x10   :  { %s160_s12 = sshll.u32 %s304_s11, 4  ;;  %s161_s12 = int_to_ptr.vmem [resolvable:$true] %s160_s12 }
  0x11   :  { %v69_v9 = vadd.f32 %v68_v7, %v67_v4 }
  0x12   :  { %148 = vmatpush.bf16.msra.mxu0 %v182_v6 }
  0x13   :  { %v70_v11 = vrot.slane %v69_v9, 2 }
  0x14   :  { %v193_v1 = vpop.eup %192 }
  0x15   :  { %v75_v5 = vmul.f32 8.0, %v193_v1  ;;  %v71_v13 = vadd.f32 %v70_v11, %v69_v9  ;;  %vm79_vm1 = vweird.f32 %v193_v1 }
  0x17   :  { %v76_v8 = vsub.f32 1.0, %v75_v5  ;;  %v72_v14 = vrot.slane %v71_v13, 1 }
  0x19   :  { %v77_v10 = vmul.f32 %v193_v1, %v76_v8  ;;  %v73_v16 = vadd.f32 %v72_v14, %v71_v13 }
  0x1b   :  { %v78_v12 = vadd.f32 %v193_v1, %v77_v10 }
  0x1d   :  { %v80_v15 = vsel %vm79_vm1, %v193_v1, %v78_v12 }
  0x1e   :  { %v81_v17 = vmul.f32 %v80_v15, %v73_v16 }
  0x20   :  { %v82_v18 = vsub.f32 %v65_v3, %v81_v17 }
  0x22   :  { %v83_v19 = vmul.f32 %v82_v18, %v82_v18 }
  0x24   :  { %v84_v20 = vsel %vm66_vm0, %v83_v19, 0.0 }
  0x25   :  { %v85_v21 = vrot.slane %v84_v20, 4 }
  0x27   :  { %v86_v22 = vadd.f32 %v85_v21, %v84_v20 }
  0x29   :  { %v87_v23 = vrot.slane %v86_v22, 2 }
  0x2b   :  { %v88_v24 = vadd.f32 %v87_v23, %v86_v22 }
  0x2d   :  { %v89_v25 = vrot.slane %v88_v24, 1 }
  0x2f   :  { %v90_v26 = vadd.f32 %v89_v25, %v88_v24 }
  0x31   :  { %v91_v27 = vmul.f32 %v90_v26, %v80_v15 }
  0x33   :  { %v93_v28 = vadd.f32 1e-05, %v91_v27 }
  0x35   :  { %194 = vrsqrt.f32 %v93_v28  ;;  %vm100_vm2 = vweird.f32 %v93_v28 }
  0x3b   :  { %v195_v29 = vpop.eup %194 }
  0x3c   :  { %v95_v30 = vmul.f32 %v195_v29, %v93_v28  ;;  %vm101_vm3 = vweird.f32 %v195_v29 }
  0x3d   :  { %vm102_vm4 = vmor %vm100_vm2, %vm101_vm3 }
  0x3e   :  { %v96_v31 = vmul.f32 %v195_v29, %v95_v30 }
  0x40   :  { %v97_v32 = vmul.f32 0.5, %v96_v31 }
  0x42   :  { %v98_v33 = vsub.f32 1.5, %v97_v32 }
  0x44   :  { %v99_v35 = vmul.f32 %v195_v29, %v98_v33 }
  0x46   :  { %v103_v36 = vsel %vm102_vm4, %v195_v29, %v99_v35 }
  0x47   :  { %v104_v37 = vmul.f32 %v103_v36, %v92_v34 }
  0x49   :  { %v106_v39 = vmul.f32 %v104_v37, %v81_v17  ;;  %v109_v40 = vperm.slane %v104_v37, 0 }
  0x4b   :  { %v107_v41 = vsub.f32 %v105_v38, %v106_v39  ;;  %v111_v42 = vmul.f32 %v109_v40, %v65_v3 }
  0x4d   :  { %v113_v43 = vperm.slane %v107_v41, 0 }
  0x4f   :  { %v115_v44 = vadd.f32 %v113_v43, %v111_v42 }
  0x51   :  { %v116_v45 = vmax.f32 %v115_v44, 0.0 }
  0x53   :  { %v117_v46 = vpack.c.bf16 %v116_v45, %v116_v45 }
  0x55   :  { %181 = vmatmul.msk.bf16.vlgmr.msra.gmra.mxu0 %vm66_vm0, %v117_v46 }
  0xd2   :  { %v150_v48 = vpop.f32.mrf.mxu0 }
  0xd3   :  { %v151_v49 = vadd.f32 %v191_v47, %v150_v48 }
  0xd5   :  { %154 = vst [vmem:[#allocation8] sm:$0xff] %v151_v49 }
  0xd6   :  { %165 = dma.vmem_to_hbm [thread:$0]  %s161_s12, 128, %s163_s2, [#allocation4]  }
  0xda   :  { %v152_v50 = vpop.f32.mrf.mxu0 }
  0xdb   :  { %296 = dma.done.wait [#allocation4], 128  }
  0xdc   :  { %297 = vsyncadd [#allocation4], 4294967168 }
  0xdd   :  { %170 = vsyncpa [#allocation3], 1 }
  0xde   :  { %171 = vsyncpa [#allocation6], 1 }
  0xdf   :  { %172 = vsyncpa [#allocation4], 1 }

</bundles_post_ra>
